<compile_context>
chip_gen: v7x
topology: tpu7x:2x2x1
jax: 0.10.0
libtpu: 0.0.40
codegen_flags: <defaults>
</compile_context>

<pallas_src>
import math

import jax
import jax.numpy as jnp
from jax.experimental import pallas as pl
from jax.experimental.pallas import tpu as pltpu


_DEFAULT_BATCH_TILE = 8192   # cap on rows per grid step (multiple of 128)
_SINGLE_STEP_MAX = 1024      # below this, one full-array block is cheapest


def _round_up(n, m):
    return ((n + m - 1) // m) * m


def q_mlp_kernel(x_ref, w1_ref, b1_ref, w2_ref, b2_ref, w3_ref, b3_ref, o_ref):
    """Fused 3-layer MLP for one batch tile.

    Layers 1/2: MXU matmuls with f32 accumulation; bias + ReLU on the VPU.
    Layer 3: (1, 64) x (bt, 64)^T NT contraction producing a lane-dense
    (1, bt) row directly (avoids an N=1 matmul and masked (bt, 1) stores).
    """
    # x may arrive bf16 (cheap HBM stream) or f32; upcast in-kernel.
    x = x_ref[...].astype(jnp.float32)

    h1 = jnp.dot(x, w1_ref[...], preferred_element_type=jnp.float32)
    h1 = jnp.maximum(h1 + b1_ref[...], 0.0)

    h2 = jnp.dot(h1, w2_ref[...], preferred_element_type=jnp.float32)
    h2 = jnp.maximum(h2 + b2_ref[...], 0.0)

    out_row = jax.lax.dot_general(
        w3_ref[...], h2,
        dimension_numbers=(((1,), (1,)), ((), ())),
        preferred_element_type=jnp.float32,
    )
    o_ref[...] = (out_row + b3_ref[...]).astype(o_ref.dtype)


def _choose_batch_tile(B, cap):
    """Rows per grid step.

    Small B: a single full-array block (no padding, no (8,128) constraint).
    Large B: >= 2 steps of a 128-multiple tile so the lane-dense (1, bt)
    output block satisfies the (8,128) rule, the final block may be partial,
    and megacore (v7x) has at least two grid steps to shard.
    """
    if B <= _SINGLE_STEP_MAX:
        return B
    num_tiles = max(2, pl.cdiv(B, cap))
    bt = _round_up(pl.cdiv(B, num_tiles), 128)
    return min(bt, _round_up(B, 128))


def q_forward(x, params, *, batch_tile=None):
    """Forward pass of Q.

    x: [B, state_dim + action_dim], f32 or bf16 (bf16 halves the HBM stream).
    params: w1 [D,128], b1 [1,128], w2 [128,64], b2 [1,64], w3 [64,1], b3 [1,1]
            (weights stored [in, out], i.e. transposed vs nn.Linear's [out, in]).
    returns: [B, 1] float32, matching `self.model(state)` in PyTorch.
    """
    B, D = x.shape

    w1 = params["w1"].astype(jnp.float32)
    b1 = params["b1"].astype(jnp.float32).reshape(1, -1)
    w2 = params["w2"].astype(jnp.float32)
    b2 = params["b2"].astype(jnp.float32).reshape(1, -1)
    w3_row = params["w3"].astype(jnp.float32).reshape(1, -1)   # (1, 64)
    b3 = params["b3"].astype(jnp.float32).reshape(1, 1)
    H1, H2 = w1.shape[1], w2.shape[1]

    if batch_tile is None:
        batch_tile = _choose_batch_tile(B, _DEFAULT_BATCH_TILE)
    else:
        batch_tile = int(batch_tile)
        batch_tile = B if batch_tile >= B else max(_round_up(batch_tile, 128), 128)
    grid = (pl.cdiv(B, batch_tile),)

    # VMEM budget derived from the tile: double-buffered x tile (lane-padded
    # to >=128 lanes) + f32 h1/h2 temporaries, with 2x margin, kept under
    # v7x's 64 MiB physical VMEM.
    x_itemsize = jnp.dtype(x.dtype).itemsize
    per_row = (2 * _round_up(D, 128) * x_itemsize
               + _round_up(H1, 128) * 4
               + _round_up(H2, 128) * 4)
    vmem_limit = int(min(max(2 * (batch_tile * per_row + (2 << 20)), 32 << 20),
                         60 << 20))

    flops = 2 * B * (D * H1 + H1 * H2 + H2 * 1)
    bytes_accessed = int(B * D * x_itemsize + B * 4
                         + 4 * (w1.size + b1.size + w2.size + b2.size
                                + w3_row.size + b3.size))

    # Constant (0, 0) index maps: weight/bias blocks are revisited every grid
    # step, so Pallas keeps them VMEM-resident instead of re-DMAing them.
    weight_spec = lambda shape: pl.BlockSpec(shape, lambda i: (0, 0))

    out = pl.pallas_call(
        q_mlp_kernel,
        out_shape=jax.ShapeDtypeStruct((1, B), jnp.float32),
        grid_spec=pltpu.PrefetchScalarGridSpec(
            num_scalar_prefetch=0,
            grid=grid,
            in_specs=[
                pl.BlockSpec((batch_tile, D), lambda i: (i, 0)),   # x tile
                weight_spec((D, H1)),       # w1
                weight_spec((1, H1)),       # b1
                weight_spec((H1, H2)),      # w2
                weight_spec((1, H2)),       # b2
                weight_spec((1, H2)),       # w3 row (1, 64)
                weight_spec((1, 1)),        # b3
            ],
            # Lane-dense output row per tile (partial final block allowed).
            out_specs=pl.BlockSpec((1, batch_tile), lambda i: (0, i)),
        ),
        compiler_params=pltpu.CompilerParams(
            dimension_semantics=("parallel",),
            vmem_limit_bytes=vmem_limit,
        ),
        cost_estimate=pl.CostEstimate(
            flops=flops, transcendentals=0, bytes_accessed=bytes_accessed),
    )(x, w1, b1, w2, b2, w3_row, b3)

    return out.reshape(B, 1)


def init_params(key, state_dim, action_dim):
    """Deterministic init mimicking nn.Linear defaults (U(-1/sqrt(fan_in), ...))."""
    d_in = state_dim + action_dim
    dims = [(d_in, 128), (128, 64), (64, 1)]
    params = {}
    for idx, (fan_in, fan_out) in enumerate(dims, start=1):
        key, kw, kb = jax.random.split(key, 3)
        bound = 1.0 / math.sqrt(fan_in)
        params[f"w{idx}"] = jax.random.uniform(
            kw, (fan_in, fan_out), jnp.float32, minval=-bound, maxval=bound
        )
        params[f"b{idx}"] = jax.random.uniform(
            kb, (1, fan_out), jnp.float32, minval=-bound, maxval=bound
        )
    return params


def reference_forward(x, params):
    h1 = jnp.maximum(x @ params["w1"] + params["b1"], 0.0)
    h2 = jnp.maximum(h1 @ params["w2"] + params["b2"], 0.0)
    return h2 @ params["w3"] + params["b3"]


if __name__ == "__main__":
    # Small shapes implied by the module: state_dim + action_dim input features.
    state_dim, action_dim = 24, 8
    D = state_dim + action_dim

    key = jax.random.PRNGKey(0)
    key, kp, kx1, kx2 = jax.random.split(key, 4)
    params = init_params(kp, state_dim, action_dim)

    # 1) Small batch, f32 x, single full-array block.
    x = jax.random.normal(kx1, (8, D), jnp.float32)
    out = jax.block_until_ready(q_forward(x, params))
    ref = reference_forward(x, params)
    assert out.shape == (8, 1)
    assert jnp.allclose(out, ref, atol=2e-3, rtol=2e-3), "f32 path mismatch"

    # 2) bf16 x stream (recommended for HBM-bound large batches); compute is
    #    still f32, so match the reference evaluated on the bf16-rounded input.
    x_bf16 = x.astype(jnp.bfloat16)
    out_bf = jax.block_until_ready(q_forward(x_bf16, params))
    ref_bf = reference_forward(x_bf16.astype(jnp.float32), params)
    assert jnp.allclose(out_bf, ref_bf, atol=2e-3, rtol=2e-3), "bf16-x path mismatch"

    # 3) Multi-step grid with a partial final block (no jnp.pad round-trip):
    #    B=300 with 128-row tiles -> 3 steps, last step only 44 valid rows.
    x2 = jax.random.normal(kx2, (300, D), jnp.float32)
    out2 = jax.block_until_ready(q_forward(x2, params, batch_tile=128))
    ref2 = reference_forward(x2, params)
    assert out2.shape == (300, 1)
    assert jnp.allclose(out2, ref2, atol=2e-3, rtol=2e-3), "partial-block mismatch"

    # TODO(synk): `fit` (MSE loss + Adam step) and `predict`'s .squeeze()/.cpu()
    # glue are training/host-side logic, not part of the forward hot path.
    print("KERNEL_OK")
</pallas_src>

<mosaic_0001>
module attributes {stable_mosaic.version = 11 : i64} {
  func.func @q_mlp_kernel(%arg0: i32, %arg1: memref<8x32xf32, #tpu.memory_space<vmem>>, %arg2: memref<32x128xf32, #tpu.memory_space<vmem>>, %arg3: memref<1x128xf32, #tpu.memory_space<vmem>>, %arg4: memref<128x64xf32, #tpu.memory_space<vmem>>, %arg5: memref<1x64xf32, #tpu.memory_space<vmem>>, %arg6: memref<1x64xf32, #tpu.memory_space<vmem>>, %arg7: memref<1x1xf32, #tpu.memory_space<vmem>>, %arg8: memref<1x8xf32, #tpu.memory_space<vmem>>) attributes {dimension_semantics = [#tpu.dimension_semantics<parallel>], iteration_bounds = array<i64: 1>, scalar_prefetch = 0 : i64, scratch_operands = 0 : i64, tpu.core_type = #tpu.core_type<tc>, window_params = [{transform_indices = @transform_0, window_bounds = array<i64: 8, 32>}, {pipeline_mode = #tpu.pipeline_mode<synchronous>, transform_indices = @transform_1, window_bounds = array<i64: 32, 128>}, {pipeline_mode = #tpu.pipeline_mode<synchronous>, transform_indices = @transform_2, window_bounds = array<i64: 1, 128>}, {pipeline_mode = #tpu.pipeline_mode<synchronous>, transform_indices = @transform_3, window_bounds = array<i64: 128, 64>}, {pipeline_mode = #tpu.pipeline_mode<synchronous>, transform_indices = @transform_4, window_bounds = array<i64: 1, 64>}, {pipeline_mode = #tpu.pipeline_mode<synchronous>, transform_indices = @transform_5, window_bounds = array<i64: 1, 64>}, {pipeline_mode = #tpu.pipeline_mode<synchronous>, transform_indices = @transform_6, window_bounds = array<i64: 1, 1>}, {transform_indices = @transform_7, window_bounds = array<i64: 1, 8>}]} {
    %c0 = arith.constant 0 : index
    %c0_0 = arith.constant 0 : index
    %0 = vector.load %arg1[%c0, %c0_0] : memref<8x32xf32, #tpu.memory_space<vmem>>, vector<8x32xf32>
    %c0_1 = arith.constant 0 : index
    %c0_2 = arith.constant 0 : index
    %1 = vector.load %arg2[%c0_1, %c0_2] : memref<32x128xf32, #tpu.memory_space<vmem>>, vector<32x128xf32>
    %cst = arith.constant dense<0.000000e+00> : vector<8x128xf32>
    %2 = tpu.matmul %0, %1, %cst {dimension_numbers = #tpu.dot_dimension_numbers<[1], [0], [0], [1], [0, 0, 1, 1], [], []>} : vector<8x32xf32>, vector<32x128xf32>, vector<8x128xf32> -> vector<8x128xf32>
    %c0_3 = arith.constant 0 : index
    %c0_4 = arith.constant 0 : index
    %3 = vector.load %arg3[%c0_3, %c0_4] : memref<1x128xf32, #tpu.memory_space<vmem>>, vector<1x128xf32>
    %4 = vector.broadcast %3 : vector<1x128xf32> to vector<8x128xf32>
    %5 = arith.addf %2, %4 : vector<8x128xf32>
    %cst_5 = arith.constant 0.000000e+00 : f32
    %6 = vector.broadcast %cst_5 : f32 to vector<8x128xf32>
    %7 = arith.maximumf %5, %6 : vector<8x128xf32>
    %c0_6 = arith.constant 0 : index
    %c0_7 = arith.constant 0 : index
    %8 = vector.load %arg4[%c0_6, %c0_7] : memref<128x64xf32, #tpu.memory_space<vmem>>, vector<128x64xf32>
    %cst_8 = arith.constant dense<0.000000e+00> : vector<8x64xf32>
    %9 = tpu.matmul %7, %8, %cst_8 {dimension_numbers = #tpu.dot_dimension_numbers<[1], [0], [0], [1], [0, 0, 1, 1], [], []>} : vector<8x128xf32>, vector<128x64xf32>, vector<8x64xf32> -> vector<8x64xf32>
    %c0_9 = arith.constant 0 : index
    %c0_10 = arith.constant 0 : index
    %10 = vector.load %arg5[%c0_9, %c0_10] : memref<1x64xf32, #tpu.memory_space<vmem>>, vector<1x64xf32>
    %11 = vector.broadcast %10 : vector<1x64xf32> to vector<8x64xf32>
    %12 = arith.addf %9, %11 : vector<8x64xf32>
    %cst_11 = arith.constant 0.000000e+00 : f32
    %13 = vector.broadcast %cst_11 : f32 to vector<8x64xf32>
    %14 = arith.maximumf %12, %13 : vector<8x64xf32>
    %c0_12 = arith.constant 0 : index
    %c0_13 = arith.constant 0 : index
    %15 = vector.load %arg6[%c0_12, %c0_13] : memref<1x64xf32, #tpu.memory_space<vmem>>, vector<1x64xf32>
    %cst_14 = arith.constant dense<0.000000e+00> : vector<1x8xf32>
    %16 = tpu.matmul %15, %14, %cst_14 {dimension_numbers = #tpu.dot_dimension_numbers<[1], [1], [0], [0], [0, 0, 1, 0], [], []>} : vector<1x64xf32>, vector<8x64xf32>, vector<1x8xf32> -> vector<1x8xf32>
    %c0_15 = arith.constant 0 : index
    %c0_16 = arith.constant 0 : index
    %17 = vector.load %arg7[%c0_15, %c0_16] : memref<1x1xf32, #tpu.memory_space<vmem>>, vector<1x1xf32>
    %18 = vector.broadcast %17 : vector<1x1xf32> to vector<1x8xf32>
    %19 = arith.addf %16, %18 : vector<1x8xf32>
    %c0_17 = arith.constant 0 : index
    %c0_18 = arith.constant 0 : index
    %20 = vector.load %arg8[%c0_17, %c0_18] : memref<1x8xf32, #tpu.memory_space<vmem>>, vector<1x8xf32>
    tpu.vector_store %arg8[%c0_17, %c0_18], %19 {strides = array<i32>} : memref<1x8xf32, #tpu.memory_space<vmem>>, vector<1x8xf32>,
    return
  }
  func.func @transform_0(%arg0: i32) -> (i32, i32) {
    %c0_i32 = arith.constant 0 : i32
    %c0_i32_0 = arith.constant 0 : i32
    return %arg0, %c0_i32 : i32, i32
  }
  func.func @transform_1(%arg0: i32) -> (i32, i32) {
    %c0_i32 = arith.constant 0 : i32
    %c0_i32_0 = arith.constant 0 : i32
    %c0_i32_1 = arith.constant 0 : i32
    return %c0_i32, %c0_i32_0 : i32, i32
  }
  func.func @transform_2(%arg0: i32) -> (i32, i32) {
    %c0_i32 = arith.constant 0 : i32
    %c0_i32_0 = arith.constant 0 : i32
    %c0_i32_1 = arith.constant 0 : i32
    return %c0_i32, %c0_i32_0 : i32, i32
  }
  func.func @transform_3(%arg0: i32) -> (i32, i32) {
    %c0_i32 = arith.constant 0 : i32
    %c0_i32_0 = arith.constant 0 : i32
    %c0_i32_1 = arith.constant 0 : i32
    return %c0_i32, %c0_i32_0 : i32, i32
  }
  func.func @transform_4(%arg0: i32) -> (i32, i32) {
    %c0_i32 = arith.constant 0 : i32
    %c0_i32_0 = arith.constant 0 : i32
    %c0_i32_1 = arith.constant 0 : i32
    return %c0_i32, %c0_i32_0 : i32, i32
  }
  func.func @transform_5(%arg0: i32) -> (i32, i32) {
    %c0_i32 = arith.constant 0 : i32
    %c0_i32_0 = arith.constant 0 : i32
    %c0_i32_1 = arith.constant 0 : i32
    return %c0_i32, %c0_i32_0 : i32, i32
  }
  func.func @transform_6(%arg0: i32) -> (i32, i32) {
    %c0_i32 = arith.constant 0 : i32
    %c0_i32_0 = arith.constant 0 : i32
    %c0_i32_1 = arith.constant 0 : i32
    return %c0_i32, %c0_i32_0 : i32, i32
  }
  func.func @transform_7(%arg0: i32) -> (i32, i32) {
    %c0_i32 = arith.constant 0 : i32
    %c0_i32_0 = arith.constant 0 : i32
    return %c0_i32, %arg0 : i32, i32
  }
}

</mosaic_0001>

<bundles_post_ra>
// kernel: tpu_custom_call.1
= control target key start
LH: loop header
LB: loop body
LE: loop exit
PB: predicated region body
PF: predicated region fallthrough
CT: control target
= control target key end

     0   :  { %s589_s0 = inlined_call_operand.vmem [shape: f32[8,32], index: 0, kind: input, shape index: {}]   ;;  %s590_s1 = inlined_call_operand.vmem [shape: f32[32,128], index: 1, kind: input, shape index: {}]   ;;  %s591_s2 = inlined_call_operand.vmem [shape: f32[1,128], index: 2, kind: input, shape index: {}]   ;;  %s592_s3 = inlined_call_operand.vmem [shape: f32[128,64], index: 3, kind: input, shape index: {}]   ;;  %s593_s4 = inlined_call_operand.vmem [shape: f32[1,64], index: 4, kind: input, shape index: {}]   ;;  %s594_s5 = inlined_call_operand.vmem [shape: f32[1,64], index: 5, kind: input, shape index: {}]   ;;  %s595_s6 = inlined_call_operand.<no memory space> [shape: f32[1,1], index: 6, kind: input, shape index: {}]   ;;  %s596_s7 = inlined_call_operand.hbm [shape: f32[1,8], index: 7, kind: output, shape index: {}]  }
   0x1   :  { %v12_v0 = vstv %s595_s6 }
   0x2   :  { %13 = vst [vmem:[#allocation2] sm:$0x1] %v12_v0 }
   0x3   :  { %v30_v1 = vld [vmem:[%s590_s1] sm:$0xff]  ;;  %v31_v2 = vld [vmem:[%s590_s1 + $0x8] sm:$0xff]  ;;  %v32_v3 = vld [vmem:[%s590_s1 + $0x10] sm:$0xff]  ;;  %v454_v4 = vmov 0.0|0.0   ;;  %vm455_vm0 = vmmov 0   ;;  %v456_v7 = vmov 0.0  }
   0x4   :  { %394 = vmatprep.subr.bf16.mxu0 %v454_v4  ;;  %v395_v5 = vpack.c.bf16 %v31_v2, %v30_v1  ;;  %v33_v6 = vld [vmem:[%s590_s1 + $0x18] sm:$0xff]  ;;  %351 = vmatprep.mubr.msk.f32.mxu0 %vm455_vm0, %v456_v7  ;;  %v116_v8 = vld [vmem:[%s592_s3] sm:$0xff]  ;;  %v117_v9 = vld [vmem:[%s592_s3 + $0x8] sm:$0xff] }
   0x5   :  { %400 = vmatprep.subr.bf16.mxu1 %v454_v4  ;;  %v118_v10 = vld [vmem:[%s592_s3 + $0x10] sm:$0xff]  ;;  %v119_v11 = vld [vmem:[%s592_s3 + $0x18] sm:$0xff]  ;;  %386 = vmatprep.mubr.msk.f32.mxu1 %vm455_vm0, %v456_v7  ;;  %v398_v12 = vpack.c.bf16 %v33_v6, %v32_v3  ;;  %v401_v13 = vpack.c.bf16 %v117_v9, %v116_v8  ;;  %v120_v15 = vld [vmem:[%s592_s3 + $0x20] sm:$0xff] }
   0x6   :  { %396 = vmatpush3.bf16.msra.mxu0 %v395_v5  ;;  %v404_v14 = vpack.c.bf16 %v119_v11, %v118_v10  ;;  %v121_v16 = vld [vmem:[%s592_s3 + $0x28] sm:$0xff] }
   0x7   :  { %397 = vmatprep.subr.bf16.mxu0 %v454_v4  ;;  %402 = vmatpush3.bf16.msra.mxu1 %v401_v13 }
   0x8   :  { %403 = vmatprep.subr.bf16.mxu1 %v454_v4 }
   0x9   :  { %14 = vsyncpa [#allocation4], 0  ;;  %v29_v17 = vld [vmem:[%s589_s0] sm:$0xff]  ;;  %vm41_vm1 = vcmask 261120   ;;  %v407_v18 = vpack.c.bf16 %v121_v16, %v120_v15  ;;  %v122_v19 = vld [vmem:[%s592_s3 + $0x30] sm:$0xff]  ;;  %v457_v40 = vmov 0   ;;  %v217_v47 = vlaneseq }
   0xa   :  { %399 = vmatpush3.bf16.msra.mxu0 %v398_v12  ;;  %v123_v20 = vld [vmem:[%s592_s3 + $0x38] sm:$0xff]  ;;  %v124_v22 = vld [vmem:[%s592_s3 + $0x40] sm:$0xff]  ;;  %v125_v23 = vld [vmem:[%s592_s3 + $0x48] sm:$0xff]  ;;  %429 = vset.pattern.permute.xlu0 %v457_v40  ;;  %vm221_vm2 = vcmask 523264   ;;  %s458_s21 = smov [#allocation3]   ;;  %vm298_vm3 = vcmask 57344  }
   0xb   :  { %389 = vmatprep.subr.mxu0 %v456_v7  ;;  %405 = vmatpush3.bf16.msra.mxu1 %v404_v14  ;;  %v410_v21 = vpack.c.bf16 %v123_v20, %v122_v19  ;;  %v413_v24 = vpack.c.bf16 %v125_v23, %v124_v22  ;;  %v126_v25 = vld [vmem:[%s592_s3 + $0x50] sm:$0xff]  ;;  %v127_v26 = vld [vmem:[%s592_s3 + $0x58] sm:$0xff]  ;;  %v128_v28 = vld [vmem:[%s592_s3 + $0x60] sm:$0xff]  ;;  %v218_v48 = vshrl.u32 %v217_v47, 7  ;;  %s306_s22 = sshll.u32 %s458_s21, 4  ;;  %s307_s22 = int_to_ptr.vmem [resolvable:$true] %s306_s22 }
   0xc   :  { %406 = vmatprep.subr.bf16.mxu1 %v454_v4  ;;  %v416_v27 = vpack.c.bf16 %v127_v26, %v126_v25  ;;  %v129_v29 = vld [vmem:[%s592_s3 + $0x68] sm:$0xff]  ;;  %v130_v31 = vld [vmem:[%s592_s3 + $0x70] sm:$0xff]  ;;  %v131_v32 = vld [vmem:[%s592_s3 + $0x78] sm:$0xff]  ;;  %s434_s23 = scalar_lea.vmem %s307_s22, 32  ;;  %p435_p1 = scmp.lt.s32.totalorder %s307_s22, %s307_s22 }
   0xd   :  { %352 = vmatmul.mubr.msk.f32.vlgmr.msra.gmra.mrb[0].mxu0 %vm41_vm1, %v29_v17  ;;  %v419_v30 = vpack.c.bf16 %v129_v29, %v128_v28  ;;  %v422_v33 = vpack.c.bf16 %v131_v32, %v130_v31  ;;  %v314_v34 = vld [vmem:[%s591_s2] ss:$0 sm:$0xff]  ;;  %v219_v49 = vsub.s32 0, %v218_v48 }
   0xe   :  { %391 = vmatprep.mubr.msk.f32.mxu0 %vm455_vm0, %v456_v7  ;;  %v211_v39 = vld [vmem:[#allocation2] sm:$0x1] }
   0xf   :  { %408 = vmatpush3.bf16.msra.mxu1 %v407_v18  ;;  %214 = vperm.xlu0 %429, %v211_v39   ;;  %v316_v41 = vld [vmem:[%s593_s4] ss:$0 sm:$0xff]  ;;  %s430_s4 = scalar_lea.vmem %s307_s22, 16 }
  0x10   :  { %409 = vmatprep.subr.bf16.mxu1 %v454_v4  ;;  %v210_v46 = vld [vmem:[%s594_s5] sm:$0x1]  ;;  %p431_p0 = scmp.ne.s32.totalorder %s307_s22, %s430_s4  ;;  %p436_p2 = scmp.lt.s32.totalorder %s434_s23, %s430_s4 }
  0x12   :  { %p437_p3 = por %p436_p2, %p435_p1 }
  0x13   :  { %411 = vmatpush3.bf16.msra.mxu1 %v410_v21 }
  0x14   :  { %412 = vmatprep.subr.bf16.mxu1 %v454_v4  ;;  %p438_p4 = pnand %p437_p3, %p431_p0 }
  0x17   :  { %414 = vmatpush3.bf16.msra.mxu1 %v413_v24 }
  0x18   :  { %415 = vmatprep.subr.bf16.mxu1 %v454_v4 }
  0x1b   :  { %417 = vmatpush3.bf16.msra.mxu1 %v416_v27 }
  0x1c   :  { %418 = vmatprep.subr.bf16.mxu1 %v454_v4 }
  0x1f   :  { %420 = vmatpush3.bf16.msra.mxu1 %v419_v30 }
  0x20   :  { %421 = vmatprep.subr.bf16.mxu1 %v454_v4 }
  0x23   :  { %423 = vmatpush3.bf16.msra.mxu1 %v422_v33 }
  0x8e   :  { %v215_v50 = vpop.permute.xlu0 %214 }
  0x8f   :  { %v220_v51 = vrot.slane %v215_v50, %v219_v49 }
  0xe0   :  { %v111_v35 = vpop.f32.mrb[0].mxu0 }
  0xe1   :  { %v112_v36 = vadd.f32 %v314_v34, %v111_v35  ;;  %v353_v37 = vpop.f32.mrb[1].mxu0 }
  0xe3   :  { %v115_v38 = vmax.f32 %v112_v36, 0.0 }
  0xe5   :  { %387 = vmatmul.mubr.f32.vlgmr.msra.gmra.mrb[0].mxu1 %v115_v38 }
 0x1b8   :  { %v205_v42 = vpop.f32.mrb[0].mxu1 }
 0x1b9   :  { %v206_v43 = vadd.f32 %v316_v41, %v205_v42  ;;  %v388_v44 = vpop.f32.mrb[1].mxu1 }
 0x1bb   :  { %v209_v45 = vmax.f32 %v206_v43, 0.0 }
 0x1bd   :  { %390 = vmatpush3.xpose.msk.msra.mxu0 %vm221_vm2, %v209_v45 }
 0x1c0   :  { %392 = vmatmul.mubr.msk.f32.vlgmr.msra.gmra.mrb[2].mxu0 %vm221_vm2, %v210_v46 }
 0x293   :  { %v294_v52 = vpop.f32.mrb[2].mxu0 }
 0x294   :  { %v295_v53 = vadd.f32 %v294_v52, %v220_v51  ;;  %v393_v54 = vpop.f32.mrb[3].mxu0 }
 0x296   :  { %299 = vst.msk [vmem:[#allocation3] sm:$0x1] %vm298_vm3, %v295_v53 }
 0x297   :  { %441 = shalt.err (!%p438_p4)
}
 0x298   :  { %s442_s25 = scalar_lea.hbm %s596_s7, 16 }
 0x299   :  { %p443_p5 = scmp.ne.s32.totalorder %s596_s7, %s442_s25  ;;  %p446_p6 = scmp.lt.u32.totalorder %s442_s25, %s596_s7 }
 0x29b   :  { %p448_p7 = pnand %p446_p6, %p443_p5 }
 0x29d   :  { %451 = shalt.err (!%p448_p7)
}
 0x29e   :  { %309 = dma.vmem_to_hbm [thread:$0]  %s307_s22, 16, %s596_s7, [#allocation4]  }
 0x29f   :  { %452 = dma.done.wait [#allocation4], 16  }
 0x2a0   :  { %453 = vsyncadd [#allocation4], 4294967280 }
 0x2a1   :  { %313 = vsyncpa [#allocation4], 1 }

</bundles_post_ra>
